<compile_context>
chip_gen: v5e
topology: v5e:2x2
jax: 0.10.0
libtpu: 0.0.40
codegen_flags: <defaults>
</compile_context>

<pallas_src>
import jax
import jax.numpy as jnp
from jax.experimental import pallas as pl
from jax.experimental.pallas import tpu as pltpu


def _round_up(a: int, m: int) -> int:
    return (a + m - 1) // m * m


def mlp_v2_kernel(x_ref, w1_ref, b1_ref, w2_ref, b2_ref, w3_ref, b3_ref, o_ref):
    # In-kernel bf16 cast: rides the VPU (slack), avoids a separate XLA pass over x.
    x = x_ref[...].astype(jnp.bfloat16)
    # Layer 1: bf16 x bf16 -> f32 on the MXU; bias + ReLU in f32 on the VPU.
    h1 = jnp.dot(x, w1_ref[...], preferred_element_type=jnp.float32)
    h1 = jnp.maximum(h1 + b1_ref[...], 0.0)
    # Layer 2 (dominant FLOPs, K=256 keeps the MXU full).
    h2 = jnp.dot(h1.astype(jnp.bfloat16), w2_ref[...],
                 preferred_element_type=jnp.float32)
    h2 = jnp.maximum(h2 + b2_ref[...], 0.0)
    # Output layer: lane-dense 128-wide RHS for the MXU, but store only the real
    # n_classes columns (masked vst; HBM writeback is the scarce resource here).
    y = jnp.dot(h2.astype(jnp.bfloat16), w3_ref[...],
                preferred_element_type=jnp.float32)
    nc = o_ref.shape[1]
    o_ref[...] = (y[:, :nc] + b3_ref[...]).astype(o_ref.dtype)


def mlp_v2_forward(x, params, *, tile_b=4096):
    """x: [B, n_features] f32; params: PyTorch-convention weights (out, in)."""
    B, F = x.shape
    hidden = params["w1"].shape[0]
    n_classes = params["w3"].shape[0]

    # Lane-dense RHS width for the final matmul (compute-only padding; not stored).
    C_PAD = max(128, _round_up(n_classes, 128))

    # --- batch tiling ---
    # Pad B to a multiple of 8 (sublane), cap the tile so the grid has >=2 steps
    # when possible (v7x has 2 TensorCores), pad B to a tile multiple.
    b8 = _round_up(B, 8)
    half = max(8, _round_up(pl.cdiv(b8, 2), 8))
    TILE_B = max(8, min(tile_b, half))
    B_pad = _round_up(b8, TILE_B)
    if B_pad != B:
        x = jnp.zeros((B_pad, F), x.dtype).at[:B].set(x)

    # --- weight prep: [in, out] layout, bf16 for the MXU, f32 biases ---
    w1_t = params["w1"].T.astype(jnp.bfloat16)                     # (F, H)
    w2_t = params["w2"].T.astype(jnp.bfloat16)                     # (H, H)
    w3_t = jnp.zeros((hidden, C_PAD), jnp.bfloat16)
    w3_t = w3_t.at[:, :n_classes].set(params["w3"].T.astype(jnp.bfloat16))
    b1 = params["b1"].reshape(1, -1).astype(jnp.float32)           # (1, H)
    b2 = params["b2"].reshape(1, -1).astype(jnp.float32)           # (1, H)
    b3 = params["b3"].reshape(1, -1).astype(jnp.float32)           # (1, NC)

    grid = (B_pad // TILE_B,)

    # Weights/biases: full-array blocks with a constant block index -> resident
    # in VMEM across all grid steps (no per-step re-DMA).
    def const_spec(shape):
        return pl.BlockSpec(shape, lambda i, _s=shape: (0,) * len(_s))

    in_specs = [
        pl.BlockSpec((TILE_B, F), lambda i: (i, 0)),   # x: batch-tiled, f32
        const_spec(w1_t.shape),
        const_spec(b1.shape),
        const_spec(w2_t.shape),
        const_spec(b2.shape),
        const_spec(w3_t.shape),
        const_spec(b3.shape),
    ]
    # Output block's last dim equals the full array dim (n_classes) -> allowed,
    # and only ~40 B/row of writeback instead of 512 B/row of padded f32.
    out_spec = pl.BlockSpec((TILE_B, n_classes), lambda i: (i, 0))

    flops = 2 * B_pad * (F * hidden + hidden * hidden + hidden * C_PAD)
    bytes_accessed = (
        B_pad * F * 4                                        # x read (f32)
        + (w1_t.size + w2_t.size + w3_t.size) * 2            # bf16 weights
        + (b1.size + b2.size + b3.size) * 4                  # f32 biases
        + B_pad * n_classes * 4                              # trimmed output
    )

    out = pl.pallas_call(
        mlp_v2_kernel,
        out_shape=jax.ShapeDtypeStruct((B_pad, n_classes), jnp.float32),
        grid=grid,
        in_specs=in_specs,
        out_specs=out_spec,
        compiler_params=pltpu.CompilerParams(
            dimension_semantics=("parallel",),
            vmem_limit_bytes=48 * 1024 * 1024),
        cost_estimate=pl.CostEstimate(
            flops=flops, transcendentals=0, bytes_accessed=bytes_accessed),
    )(x, w1_t, b1, w2_t, b2, w3_t, b3)

    return out[:B] if B_pad != B else out


def init_params(key, n_features, n_classes, hidden=256):
    """Deterministic init mimicking PyTorch nn.Linear (uniform ~ U(-k, k))."""
    ks = jax.random.split(key, 6)

    def linear(kw, kb, fan_in, fan_out):
        bound = 1.0 / jnp.sqrt(fan_in)
        w = jax.random.uniform(kw, (fan_out, fan_in), jnp.float32, -bound, bound)
        b = jax.random.uniform(kb, (fan_out,), jnp.float32, -bound, bound)
        return w, b

    w1, b1 = linear(ks[0], ks[1], n_features, hidden)
    w2, b2 = linear(ks[2], ks[3], hidden, hidden)
    w3, b3 = linear(ks[4], ks[5], hidden, n_classes)
    return {"w1": w1, "b1": b1, "w2": w2, "b2": b2, "w3": w3, "b3": b3}


def reference_forward(x, p):
    h = jnp.maximum(x @ p["w1"].T + p["b1"], 0.0)
    h = jnp.maximum(h @ p["w2"].T + p["b2"], 0.0)
    return h @ p["w3"].T + p["b3"]


if __name__ == "__main__":
    key = jax.random.PRNGKey(0)
    kx, kp = jax.random.split(key)

    batch, n_features, n_classes = 8, 32, 10
    x = jax.random.normal(kx, (batch, n_features), jnp.float32)
    params = init_params(kp, n_features, n_classes)

    out = mlp_v2_forward(x, params)
    out = jax.block_until_ready(out)

    ref = reference_forward(x, params)
    assert out.shape == (batch, n_classes)
    # bf16 MXU inputs (f32 accumulate) -> loosen tolerance vs the f32 reference;
    # this is the intended precision/throughput tradeoff, not a bug.
    assert jnp.allclose(out, ref, atol=3e-2, rtol=3e-2), "mismatch vs reference"

    print("KERNEL_OK")
</pallas_src>

<mosaic_0001>
module attributes {stable_mosaic.version = 11 : i64} {
  func.func @mlp_v2_kernel(%arg0: i32, %arg1: memref<8x32xf32, #tpu.memory_space<vmem>>, %arg2: memref<32x256xbf16, #tpu.memory_space<vmem>>, %arg3: memref<1x256xf32, #tpu.memory_space<vmem>>, %arg4: memref<256x256xbf16, #tpu.memory_space<vmem>>, %arg5: memref<1x256xf32, #tpu.memory_space<vmem>>, %arg6: memref<256x128xbf16, #tpu.memory_space<vmem>>, %arg7: memref<1x10xf32, #tpu.memory_space<vmem>>, %arg8: memref<8x10xf32, #tpu.memory_space<vmem>>) attributes {dimension_semantics = [#tpu.dimension_semantics<parallel>], iteration_bounds = array<i64: 1>, scalar_prefetch = 0 : i64, scratch_operands = 0 : i64, tpu.core_type = #tpu.core_type<tc>, window_params = [{transform_indices = @transform_0, window_bounds = array<i64: 8, 32>}, {pipeline_mode = #tpu.pipeline_mode<synchronous>, transform_indices = @transform_1, window_bounds = array<i64: 32, 256>}, {pipeline_mode = #tpu.pipeline_mode<synchronous>, transform_indices = @transform_2, window_bounds = array<i64: 1, 256>}, {pipeline_mode = #tpu.pipeline_mode<synchronous>, transform_indices = @transform_3, window_bounds = array<i64: 256, 256>}, {pipeline_mode = #tpu.pipeline_mode<synchronous>, transform_indices = @transform_4, window_bounds = array<i64: 1, 256>}, {pipeline_mode = #tpu.pipeline_mode<synchronous>, transform_indices = @transform_5, window_bounds = array<i64: 256, 128>}, {pipeline_mode = #tpu.pipeline_mode<synchronous>, transform_indices = @transform_6, window_bounds = array<i64: 1, 10>}, {transform_indices = @transform_7, window_bounds = array<i64: 8, 10>}]} {
    %c0 = arith.constant 0 : index
    %c0_0 = arith.constant 0 : index
    %0 = vector.load %arg1[%c0, %c0_0] : memref<8x32xf32, #tpu.memory_space<vmem>>, vector<8x32xf32>
    %1 = arith.truncf %0 : vector<8x32xf32> to vector<8x32xbf16>
    %c0_1 = arith.constant 0 : index
    %c0_2 = arith.constant 0 : index
    %2 = vector.load %arg2[%c0_1, %c0_2] : memref<32x256xbf16, #tpu.memory_space<vmem>>, vector<32x256xbf16>
    %cst = arith.constant dense<0.000000e+00> : vector<8x256xf32>
    %3 = tpu.matmul %1, %2, %cst {dimension_numbers = #tpu.dot_dimension_numbers<[1], [0], [0], [1], [0, 0, 1, 1], [], []>} : vector<8x32xbf16>, vector<32x256xbf16>, vector<8x256xf32> -> vector<8x256xf32>
    %c0_3 = arith.constant 0 : index
    %c0_4 = arith.constant 0 : index
    %4 = vector.load %arg3[%c0_3, %c0_4] : memref<1x256xf32, #tpu.memory_space<vmem>>, vector<1x256xf32>
    %5 = vector.broadcast %4 : vector<1x256xf32> to vector<8x256xf32>
    %6 = arith.addf %3, %5 : vector<8x256xf32>
    %cst_5 = arith.constant 0.000000e+00 : f32
    %7 = vector.broadcast %cst_5 : f32 to vector<8x256xf32>
    %8 = arith.maximumf %6, %7 : vector<8x256xf32>
    %9 = arith.truncf %8 : vector<8x256xf32> to vector<8x256xbf16>
    %c0_6 = arith.constant 0 : index
    %c0_7 = arith.constant 0 : index
    %10 = vector.load %arg4[%c0_6, %c0_7] : memref<256x256xbf16, #tpu.memory_space<vmem>>, vector<256x256xbf16>
    %cst_8 = arith.constant dense<0.000000e+00> : vector<8x256xf32>
    %11 = tpu.matmul %9, %10, %cst_8 {dimension_numbers = #tpu.dot_dimension_numbers<[1], [0], [0], [1], [0, 0, 1, 1], [], []>} : vector<8x256xbf16>, vector<256x256xbf16>, vector<8x256xf32> -> vector<8x256xf32>
    %c0_9 = arith.constant 0 : index
    %c0_10 = arith.constant 0 : index
    %12 = vector.load %arg5[%c0_9, %c0_10] : memref<1x256xf32, #tpu.memory_space<vmem>>, vector<1x256xf32>
    %13 = vector.broadcast %12 : vector<1x256xf32> to vector<8x256xf32>
    %14 = arith.addf %11, %13 : vector<8x256xf32>
    %cst_11 = arith.constant 0.000000e+00 : f32
    %15 = vector.broadcast %cst_11 : f32 to vector<8x256xf32>
    %16 = arith.maximumf %14, %15 : vector<8x256xf32>
    %17 = arith.truncf %16 : vector<8x256xf32> to vector<8x256xbf16>
    %c0_12 = arith.constant 0 : index
    %c0_13 = arith.constant 0 : index
    %18 = vector.load %arg6[%c0_12, %c0_13] : memref<256x128xbf16, #tpu.memory_space<vmem>>, vector<256x128xbf16>
    %cst_14 = arith.constant dense<0.000000e+00> : vector<8x128xf32>
    %19 = tpu.matmul %17, %18, %cst_14 {dimension_numbers = #tpu.dot_dimension_numbers<[1], [0], [0], [1], [0, 0, 1, 1], [], []>} : vector<8x256xbf16>, vector<256x128xbf16>, vector<8x128xf32> -> vector<8x128xf32>
    %20 = vector.extract_strided_slice %19 {offsets = [0, 0], sizes = [8, 10], strides = [1, 1]} : vector<8x128xf32> to vector<8x10xf32>
    %c0_15 = arith.constant 0 : index
    %c0_16 = arith.constant 0 : index
    %21 = vector.load %arg7[%c0_15, %c0_16] : memref<1x10xf32, #tpu.memory_space<vmem>>, vector<1x10xf32>
    %22 = vector.broadcast %21 : vector<1x10xf32> to vector<8x10xf32>
    %23 = arith.addf %20, %22 : vector<8x10xf32>
    %c0_17 = arith.constant 0 : index
    %c0_18 = arith.constant 0 : index
    %24 = vector.load %arg8[%c0_17, %c0_18] : memref<8x10xf32, #tpu.memory_space<vmem>>, vector<8x10xf32>
    tpu.vector_store %arg8[%c0_17, %c0_18], %23 {strides = array<i32>} : memref<8x10xf32, #tpu.memory_space<vmem>>, vector<8x10xf32>,
    return
  }
  func.func @transform_0(%arg0: i32) -> (i32, i32) {
    %c0_i32 = arith.constant 0 : i32
    %c0_i32_0 = arith.constant 0 : i32
    return %arg0, %c0_i32 : i32, i32
  }
  func.func @transform_1(%arg0: i32) -> (i32, i32) {
    %c0_i32 = arith.constant 0 : i32
    %c0_i32_0 = arith.constant 0 : i32
    %c0_i32_1 = arith.constant 0 : i32
    return %c0_i32, %c0_i32_0 : i32, i32
  }
  func.func @transform_2(%arg0: i32) -> (i32, i32) {
    %c0_i32 = arith.constant 0 : i32
    %c0_i32_0 = arith.constant 0 : i32
    %c0_i32_1 = arith.constant 0 : i32
    return %c0_i32, %c0_i32_0 : i32, i32
  }
  func.func @transform_3(%arg0: i32) -> (i32, i32) {
    %c0_i32 = arith.constant 0 : i32
    %c0_i32_0 = arith.constant 0 : i32
    %c0_i32_1 = arith.constant 0 : i32
    return %c0_i32, %c0_i32_0 : i32, i32
  }
  func.func @transform_4(%arg0: i32) -> (i32, i32) {
    %c0_i32 = arith.constant 0 : i32
    %c0_i32_0 = arith.constant 0 : i32
    %c0_i32_1 = arith.constant 0 : i32
    return %c0_i32, %c0_i32_0 : i32, i32
  }
  func.func @transform_5(%arg0: i32) -> (i32, i32) {
    %c0_i32 = arith.constant 0 : i32
    %c0_i32_0 = arith.constant 0 : i32
    %c0_i32_1 = arith.constant 0 : i32
    return %c0_i32, %c0_i32_0 : i32, i32
  }
  func.func @transform_6(%arg0: i32) -> (i32, i32) {
    %c0_i32 = arith.constant 0 : i32
    %c0_i32_0 = arith.constant 0 : i32
    %c0_i32_1 = arith.constant 0 : i32
    return %c0_i32, %c0_i32_0 : i32, i32
  }
  func.func @transform_7(%arg0: i32) -> (i32, i32) {
    %c0_i32 = arith.constant 0 : i32
    %c0_i32_0 = arith.constant 0 : i32
    return %arg0, %c0_i32 : i32, i32
  }
}

</mosaic_0001>

<bundles_post_ra>
// kernel: tpu_custom_call.1
= control target key start
LH: loop header
LB: loop body
LE: loop exit
PB: predicated region body
PF: predicated region fallthrough
CT: control target
= control target key end

     0   :  { %12 = vsyncpa [#allocation3], 0  ;;  %s1103_s0 = inlined_call_operand.hbm [shape: f32[8,32], index: 0, kind: input, shape index: {}]   ;;  %s1104_s1 = inlined_call_operand.hbm [shape: bf16[32,256], index: 1, kind: input, shape index: {}]   ;;  %s1105_s2 = inlined_call_operand.hbm [shape: f32[1,256], index: 2, kind: input, shape index: {}]   ;;  %s1106_s3 = inlined_call_operand.hbm [shape: bf16[256,256], index: 3, kind: input, shape index: {}]   ;;  %s1107_s4 = inlined_call_operand.vmem [shape: f32[1,256], index: 4, kind: input, shape index: {}]   ;;  %s1108_s5 = inlined_call_operand.hbm [shape: bf16[256,128], index: 5, kind: input, shape index: {}]   ;;  %s1109_s6 = inlined_call_operand.vmem [shape: f32[1,10], index: 6, kind: input, shape index: {}]   ;;  %s1110_s7 = inlined_call_operand.hbm [shape: f32[8,10], index: 7, kind: output, shape index: {}]  }
   0x1   :  { %13 = vsyncpa [#allocation6], 0 }
   0x2   :  { %14 = vsyncpa [#allocation9], 0  ;;  %s31_s26 = sshll.u32 %s1104_s1, 4  ;;  %s32_s26 = int_to_ptr.hbm [resolvable:$true] %s31_s26 }
   0x3   :  { %15 = vsyncpa [#allocation4], 0  ;;  %s1027_s27 = smov [#allocation5]   ;;  %s55_s8 = sshll.u32 %s1106_s3, 4  ;;  %s56_s8 = int_to_ptr.hbm [resolvable:$true] %s55_s8 }
   0x4   :  { %s33_s28 = sshll.u32 %s1027_s27, 4  ;;  %s1028_s9 = smov 128   ;;  %s34_s28 = int_to_ptr.vmem [resolvable:$true] %s33_s28 }
   0x5   :  { %s1029_s10 = smov 8   ;;  %s1030_s11 = smov [#allocation8]  }
   0x6   :  { %39 = dma.hbm_to_vmem [thread:$0]  %s32_s26, 512, %s34_s28, [#allocation6], %s1028_s9, %s1028_s9, %s1029_s10  }
   0x7   :  { %s57_s12 = sshll.u32 %s1030_s11, 4  ;;  %s21_s15 = sshll.u32 %s1103_s0, 4  ;;  %s58_s12 = int_to_ptr.vmem [resolvable:$true] %s57_s12  ;;  %s22_s15 = int_to_ptr.hbm [resolvable:$true] %s21_s15 }
   0x8   :  { %63 = dma.hbm_to_vmem [thread:$0]  %s56_s8, 4096, %s58_s12, [#allocation9], %s1028_s9, %s1028_s9, %s1029_s10  }
   0x9   :  { %s45_s17 = sshll.u32 %s1105_s2, 4  ;;  %s1031_s18 = smov [#allocation2]   ;;  %s46_s17 = int_to_ptr.hbm [resolvable:$true] %s45_s17 }
   0xa   :  { %s23_s19 = sshll.u32 %s1031_s18, 4  ;;  %s1032_s3 = smov [#allocation7]   ;;  %s24_s19 = int_to_ptr.vmem [resolvable:$true] %s23_s19 }
   0xb   :  { %26 = dma.hbm_to_vmem [thread:$0]  %s22_s15, 128, %s24_s19, [#allocation3]  }
   0xc   :  { %s47_s20 = sshll.u32 %s1032_s3, 4  ;;  %s70_s23 = sshll.u32 %s1108_s5, 4  ;;  %s48_s20 = int_to_ptr.vmem [resolvable:$true] %s47_s20  ;;  %s71_s23 = int_to_ptr.hbm [resolvable:$true] %s70_s23 }
   0xd   :  { %50 = dma.hbm_to_vmem [thread:$0]  %s46_s17, 32, %s48_s20, [#allocation6]  }
   0xe   :  { %s1033_s0 = smov [#allocation10]   ;;  %s1034_s25 = smov 64  }
   0xf   :  { %s72_s24 = sshll.u32 %s1033_s0, 4  ;;  %s1035_s26 = smov 4   ;;  %s73_s24 = int_to_ptr.vmem [resolvable:$true] %s72_s24 }
  0x10   :  { %78 = dma.hbm_to_vmem [thread:$0]  %s71_s23, 2048, %s73_s24, [#allocation9], %s1034_s25, %s1034_s25, %s1035_s26  }
  0x11   :  { %1019 = dma.done.wait [#allocation3], 128  }
  0x12   :  { %1020 = vsyncadd [#allocation3], 4294967168 }
  0x13   :  { %1021 = dma.done.wait [#allocation6], 544  }
  0x14   :  { %1022 = vsyncadd [#allocation6], 4294966752 }
  0x15   :  { %1023 = dma.done.wait [#allocation9], 6144  }
  0x16   :  { %1024 = vsyncadd [#allocation9], 4294961152  ;;  %v612_v0 = vld [vmem:[#allocation5 + $0x10] sm:$0xf]  ;;  %v815_v1 = vld [vmem:[#allocation5 + $0x14] sm:$0xf0] }
  0x17   :  { %v814_v2 = vld [vmem:[#allocation5 + $0x14] sm:$0xf]  ;;  %v613_v3 = vor.u32 %v815_v1, %v612_v0  ;;  %v614_v4 = vld [vmem:[#allocation5 + $0x18] sm:$0xf0]  ;;  %v604_v5 = vld [vmem:[#allocation5] sm:$0xf] }
  0x18   :  { %v813_v6 = vld [vmem:[#allocation5 + $0x4] sm:$0xf0]  ;;  %v617_v7 = vor.u32 %v814_v2, %v614_v4  ;;  %v812_v8 = vld [vmem:[#allocation5 + $0x4] sm:$0xf]  ;;  %v606_v9 = vld [vmem:[#allocation5 + $0x8] sm:$0xf0] }
  0x19   :  { %v102_v10 = vld [vmem:[#allocation2] sm:$0xff]  ;;  %vm134_vm0 = vcmask 261120   ;;  %144 = vmatpush.bf16.msra.mxu0 %v613_v3  ;;  %v605_v11 = vor.u32 %v813_v6, %v604_v5  ;;  %v678_v12 = vld [vmem:[#allocation8 + $0x70] sm:$0xf]  ;;  %v609_v15 = vor.u32 %v812_v8, %v606_v9  ;;  %v670_v24 = vld [vmem:[#allocation8 + $0x60] sm:$0xf] }
  0x1a   :  { %v831_v13 = vld [vmem:[#allocation8 + $0x74] sm:$0xf0]  ;;  %v742_v14 = vld [vmem:[#allocation8 + $0xf0] sm:$0xf]  ;;  %157 = vmatpush.bf16.msra.mxu1 %v617_v7  ;;  %v830_v18 = vld [vmem:[#allocation8 + $0x74] sm:$0xf]  ;;  %v103_v25 = vpack.c.bf16 %v102_v10, %v102_v10 }
  0x1b   :  { %v679_v16 = vor.u32 %v831_v13, %v678_v12  ;;  %v847_v17 = vld [vmem:[#allocation8 + $0xf4] sm:$0xf0]  ;;  %v680_v19 = vld [vmem:[#allocation8 + $0x78] sm:$0xf0]  ;;  %v846_v22 = vld [vmem:[#allocation8 + $0xf4] sm:$0xf] }
  0x1c   :  { %v743_v20 = vor.u32 %v847_v17, %v742_v14  ;;  %v683_v21 = vor.u32 %v830_v18, %v680_v19  ;;  %v744_v23 = vld [vmem:[#allocation8 + $0xf8] sm:$0xf0]  ;;  %v829_v27 = vld [vmem:[#allocation8 + $0x64] sm:$0xf0]  ;;  %v734_v28 = vld [vmem:[#allocation8 + $0xe0] sm:$0xf] }
  0x1d   :  { %366 = vmatpush.bf16.msra.mxu2 %v679_v16  ;;  %v747_v26 = vor.u32 %v846_v22, %v744_v23  ;;  %v845_v29 = vld [vmem:[#allocation8 + $0xe4] sm:$0xf0]  ;;  %145 = vmatpush.bf16.msra.mxu0 %v605_v11  ;;  %v671_v30 = vor.u32 %v829_v27, %v670_v24  ;;  %v828_v32 = vld [vmem:[#allocation8 + $0x64] sm:$0xf]  ;;  %v672_v33 = vld [vmem:[#allocation8 + $0x68] sm:$0xf0] }
  0x1e   :  { %379 = vmatpush.bf16.msra.mxu3 %v743_v20  ;;  %v735_v31 = vor.u32 %v845_v29, %v734_v28  ;;  %v844_v34 = vld [vmem:[#allocation8 + $0xe4] sm:$0xf]  ;;  %158 = vmatpush.bf16.msra.mxu1 %v609_v15  ;;  %v675_v35 = vor.u32 %v828_v32, %v672_v33  ;;  %v736_v36 = vld [vmem:[#allocation8 + $0xe8] sm:$0xf0]  ;;  %v662_v37 = vld [vmem:[#allocation8 + $0x50] sm:$0xf] }
  0x1f   :  { %v827_v38 = vld [vmem:[#allocation8 + $0x54] sm:$0xf0]  ;;  %v739_v39 = vor.u32 %v844_v34, %v736_v36  ;;  %v726_v40 = vld [vmem:[#allocation8 + $0xd0] sm:$0xf]  ;;  %v826_v42 = vld [vmem:[#allocation8 + $0x54] sm:$0xf] }
  0x20   :  { %v843_v41 = vld [vmem:[#allocation8 + $0xd4] sm:$0xf0]  ;;  %618 = vmatmul.msk.bf16.vlgmr.msra.gmra.mxu0 %vm134_vm0, %v103_v25  ;;  %v663_v43 = vor.u32 %v827_v38, %v662_v37  ;;  %v664_v44 = vld [vmem:[#allocation8 + $0x58] sm:$0xf0]  ;;  %v842_v45 = vld [vmem:[#allocation8 + $0xd4] sm:$0xf] }
  0x21   :  { %392 = vmatpush.bf16.msrb.mxu0 %v683_v21  ;;  %367 = vmatpush.bf16.msra.mxu2 %v671_v30  ;;  %v728_v46 = vld [vmem:[#allocation8 + $0xd8] sm:$0xf0]  ;;  %v727_v47 = vor.u32 %v843_v41, %v726_v40  ;;  %v654_v48 = vld [vmem:[#allocation8 + $0x40] sm:$0xf]  ;;  %v825_v49 = vld [vmem:[#allocation8 + $0x44] sm:$0xf0]  ;;  %v667_v50 = vor.u32 %v826_v42, %v664_v44 }
  0x22   :  { %405 = vmatpush.bf16.msrb.mxu1 %v747_v26  ;;  %380 = vmatpush.bf16.msra.mxu3 %v735_v31  ;;  %v718_v51 = vld [vmem:[#allocation8 + $0xc0] sm:$0xf]  ;;  %v841_v52 = vld [vmem:[#allocation8 + $0xc4] sm:$0xf0]  ;;  %v731_v53 = vor.u32 %v842_v45, %v728_v46  ;;  %v824_v54 = vld [vmem:[#allocation8 + $0x44] sm:$0xf]  ;;  %v655_v56 = vor.u32 %v825_v49, %v654_v48 }
  0x23   :  { %619 = vmatmul.msk.bf16.vlgmr.msra.gmra.mxu1 %vm134_vm0, %v103_v25  ;;  %v656_v55 = vld [vmem:[#allocation8 + $0x48] sm:$0xf0]  ;;  %v840_v57 = vld [vmem:[#allocation8 + $0xc4] sm:$0xf]  ;;  %v719_v59 = vor.u32 %v841_v52, %v718_v51  ;;  %v646_v60 = vld [vmem:[#allocation8 + $0x30] sm:$0xf] }
  0x24   :  { %v720_v58 = vld [vmem:[#allocation8 + $0xc8] sm:$0xf0]  ;;  %v823_v61 = vld [vmem:[#allocation8 + $0x34] sm:$0xf0]  ;;  %v659_v62 = vor.u32 %v824_v54, %v656_v55  ;;  %v710_v63 = vld [vmem:[#allocation8 + $0xb0] sm:$0xf] }
  0x25   :  { %393 = vmatpush.bf16.msrb.mxu0 %v675_v35  ;;  %368 = vmatpush.bf16.msra.mxu2 %v663_v43  ;;  %v839_v0 = vld [vmem:[#allocation8 + $0xb4] sm:$0xf0]  ;;  %v723_v1 = vor.u32 %v840_v57, %v720_v58  ;;  %v822_v2 = vld [vmem:[#allocation8 + $0x34] sm:$0xf]  ;;  %v648_v3 = vld [vmem:[#allocation8 + $0x38] sm:$0xf0]  ;;  %v647_v4 = vor.u32 %v823_v61, %v646_v60 }
  0x26   :  { %406 = vmatpush.bf16.msrb.mxu1 %v739_v39  ;;  %381 = vmatpush.bf16.msra.mxu3 %v727_v47  ;;  %v838_v5 = vld [vmem:[#allocation8 + $0xb4] sm:$0xf]  ;;  %v712_v6 = vld [vmem:[#allocation8 + $0xb8] sm:$0xf0]  ;;  %v711_v7 = vor.u32 %v839_v0, %v710_v63  ;;  %v638_v8 = vld [vmem:[#allocation8 + $0x20] sm:$0xf]  ;;  %v651_v10 = vor.u32 %v822_v2, %v648_v3 }
  0x27   :  { %v821_v9 = vld [vmem:[#allocation8 + $0x24] sm:$0xf0]  ;;  %v702_v11 = vld [vmem:[#allocation8 + $0xa0] sm:$0xf]  ;;  %v715_v13 = vor.u32 %v838_v5, %v712_v6  ;;  %v820_v14 = vld [vmem:[#allocation8 + $0x24] sm:$0xf] }
  0x28   :  { %v837_v12 = vld [vmem:[#allocation8 + $0xa4] sm:$0xf0]  ;;  %v640_v15 = vld [vmem:[#allocation8 + $0x28] sm:$0xf0]  ;;  %v639_v16 = vor.u32 %v821_v9, %v638_v8  ;;  %v836_v17 = vld [vmem:[#allocation8 + $0xa4] sm:$0xf] }
  0x29   :  { %394 = vmatpush.bf16.msrb.mxu0 %v667_v50  ;;  %369 = vmatpush.bf16.msra.mxu2 %v655_v56  ;;  %v704_v18 = vld [vmem:[#allocation8 + $0xa8] sm:$0xf0]  ;;  %v703_v19 = vor.u32 %v837_v12, %v702_v11  ;;  %v643_v20 = vor.u32 %v820_v14, %v640_v15  ;;  %v630_v22 = vld [vmem:[#allocation8 + $0x10] sm:$0xf]  ;;  %v819_v23 = vld [vmem:[#allocation8 + $0x14] sm:$0xf0] }
  0x2a   :  { %407 = vmatpush.bf16.msrb.mxu1 %v731_v53  ;;  %382 = vmatpush.bf16.msra.mxu3 %v719_v59  ;;  %v707_v21 = vor.u32 %v836_v17, %v704_v18  ;;  %v694_v24 = vld [vmem:[#allocation8 + $0x90] sm:$0xf]  ;;  %v631_v25 = vor.u32 %v819_v23, %v630_v22  ;;  %v835_v26 = vld [vmem:[#allocation8 + $0x94] sm:$0xf0]  ;;  %v818_v27 = vld [vmem:[#allocation8 + $0x14] sm:$0xf] }
  0x2b   :  { %v632_v28 = vld [vmem:[#allocation8 + $0x18] sm:$0xf0]  ;;  %v695_v29 = vor.u32 %v835_v26, %v694_v24  ;;  %v834_v31 = vld [vmem:[#allocation8 + $0x94] sm:$0xf]  ;;  %v622_v34 = vld [vmem:[#allocation8] sm:$0xf] }
  0x2c   :  { %v635_v30 = vor.u32 %v818_v27, %v632_v28  ;;  %v696_v32 = vld [vmem:[#allocation8 + $0x98] sm:$0xf0]  ;;  %v817_v35 = vld [vmem:[#allocation8 + $0x4] sm:$0xf0]  ;;  %v686_v36 = vld [vmem:[#allocation8 + $0x80] sm:$0xf] }
  0x2d   :  { %395 = vmatpush.bf16.msrb.mxu0 %v659_v62  ;;  %370 = vmatpush.bf16.msra.mxu2 %v647_v4  ;;  %v699_v33 = vor.u32 %v834_v31, %v696_v32  ;;  %v623_v37 = vor.u32 %v817_v35, %v622_v34  ;;  %v833_v38 = vld [vmem:[#allocation8 + $0x84] sm:$0xf0]  ;;  %v816_v39 = vld [vmem:[#allocation8 + $0x4] sm:$0xf]  ;;  %v624_v40 = vld [vmem:[#allocation8 + $0x8] sm:$0xf0] }
  0x2e   :  { %408 = vmatpush.bf16.msrb.mxu1 %v723_v1  ;;  %383 = vmatpush.bf16.msra.mxu3 %v711_v7  ;;  %v687_v41 = vor.u32 %v833_v38, %v686_v36  ;;  %v627_v42 = vor.u32 %v816_v39, %v624_v40  ;;  %v832_v43 = vld [vmem:[#allocation8 + $0x84] sm:$0xf]  ;;  %v688_v44 = vld [vmem:[#allocation8 + $0x88] sm:$0xf0]  ;;  %v863_v46 = vld [vmem:[#allocation10 + $0x78] sm:$0xff]  ;;  %s1036_s28 = smov [#allocation11]  }
  0x2f   :  { %v691_v45 = vor.u32 %v832_v43, %v688_v44  ;;  %v855_v47 = vld [vmem:[#allocation10 + $0x38] sm:$0xff]  ;;  %v862_v48 = vld [vmem:[#allocation10 + $0x70] sm:$0xff]  ;;  %v861_v50 = vld [vmem:[#allocation10 + $0x68] sm:$0xff]  ;;  %s588_s29 = sshll.u32 %s1036_s28, 4  ;;  %s590_s9 = sshll.u32 %s1110_s7, 4  ;;  %vm581_vm1 = vcmask 80896   ;;  %s589_s29 = int_to_ptr.vmem [resolvable:$true] %s588_s29  ;;  %s591_s9 = int_to_ptr.hbm [resolvable:$true] %s590_s9 }
  0x30   :  { %v854_v49 = vld [vmem:[#allocation10 + $0x30] sm:$0xff]  ;;  %v853_v51 = vld [vmem:[#allocation10 + $0x28] sm:$0xff]  ;;  %v860_v52 = vld [vmem:[#allocation10 + $0x60] sm:$0xff] }
  0x31   :  { %396 = vmatpush.bf16.msrb.mxu0 %v651_v10  ;;  %371 = vmatpush.bf16.msra.mxu2 %v639_v16  ;;  %v852_v53 = vld [vmem:[#allocation10 + $0x20] sm:$0xff]  ;;  %v859_v54 = vld [vmem:[#allocation10 + $0x58] sm:$0xff]  ;;  %v858_v56 = vld [vmem:[#allocation10 + $0x50] sm:$0xff] }
  0x32   :  { %409 = vmatpush.bf16.msrb.mxu1 %v715_v13  ;;  %384 = vmatpush.bf16.msra.mxu3 %v703_v19  ;;  %v108_v55 = vld [vmem:[#allocation7] sm:$0x3]  ;;  %v857_v6 = vld [vmem:[#allocation10 + $0x48] sm:$0xff]  ;;  %v850_v7 = vld [vmem:[#allocation10 + $0x10] sm:$0xff] }
  0x33   :  { %v110_v57 = vperm.slane %v108_v55, 0  ;;  %v111_v58 = vperm.slane %v108_v55, 1  ;;  %v851_v5 = vld [vmem:[#allocation10 + $0x18] sm:$0xff]  ;;  %v856_v8 = vld [vmem:[#allocation10 + $0x40] sm:$0xff]  ;;  %v849_v9 = vld [vmem:[#allocation10 + $0x8] sm:$0xff] }
  0x34   :  { %v848_v10 = vld [vmem:[#allocation10] sm:$0xff]  ;;  %v200_v11 = vld [vmem:[%s1107_s4] sm:$0x3] }
  0x35   :  { %397 = vmatpush.bf16.msrb.mxu0 %v643_v20  ;;  %372 = vmatpush.bf16.msra.mxu2 %v631_v25  ;;  %v203_v12 = vperm.slane %v200_v11, 1  ;;  %v202_v17 = vperm.slane %v200_v11, 0  ;;  %v874_v31 = vld [vmem:[%s1109_s6] ss:$0 sm:$0xff] }
  0x36   :  { %410 = vmatpush.bf16.msrb.mxu1 %v707_v21  ;;  %385 = vmatpush.bf16.msra.mxu3 %v695_v29 }
  0x39   :  { %398 = vmatpush.bf16.msrb.mxu0 %v635_v30  ;;  %373 = vmatpush.bf16.msra.mxu2 %v623_v37 }
  0x3a   :  { %411 = vmatpush.bf16.msrb.mxu1 %v699_v33  ;;  %386 = vmatpush.bf16.msra.mxu3 %v687_v41 }
  0x3d   :  { %399 = vmatpush.bf16.msrb.mxu0 %v627_v42  ;;  %550 = vmatpush.bf16.msrb.mxu2 %v855_v47 }
  0x3e   :  { %412 = vmatpush.bf16.msrb.mxu1 %v691_v45  ;;  %563 = vmatpush.bf16.msrb.mxu3 %v863_v46 }
  0x41   :  { %551 = vmatpush.bf16.msrb.mxu2 %v854_v49 }
  0x42   :  { %564 = vmatpush.bf16.msrb.mxu3 %v862_v48 }
  0x45   :  { %552 = vmatpush.bf16.msrb.mxu2 %v853_v51 }
  0x46   :  { %565 = vmatpush.bf16.msrb.mxu3 %v861_v50 }
  0x49   :  { %553 = vmatpush.bf16.msrb.mxu2 %v852_v53 }
  0x4a   :  { %566 = vmatpush.bf16.msrb.mxu3 %v860_v52 }
  0x4d   :  { %554 = vmatpush.bf16.msrb.mxu2 %v851_v5 }
  0x4e   :  { %567 = vmatpush.bf16.msrb.mxu3 %v859_v54 }
  0x51   :  { %555 = vmatpush.bf16.msrb.mxu2 %v850_v7 }
  0x52   :  { %568 = vmatpush.bf16.msrb.mxu3 %v858_v56 }
  0x55   :  { %556 = vmatpush.bf16.msrb.mxu2 %v849_v9 }
  0x56   :  { %569 = vmatpush.bf16.msrb.mxu3 %v857_v6 }
  0x59   :  { %557 = vmatpush.bf16.msrb.mxu2 %v848_v10 }
  0x5a   :  { %570 = vmatpush.bf16.msrb.mxu3 %v856_v8 }
  0x9d   :  { %v147_v59 = vpop.f32.mrf.mxu0 }
  0x9e   :  { %v148_v60 = vadd.f32 %v147_v59, %v110_v57 }
  0xa0   :  { %v160_v61 = vpop.f32.mrf.mxu1  ;;  %v164_v63 = vmax.f32 %v148_v60, 0.0 }
  0xa1   :  { %v161_v62 = vadd.f32 %v160_v61, %v111_v58 }
  0xa2   :  { %v166_v1 = vpack.c.bf16 %v164_v63, %v164_v63 }
  0xa3   :  { %v165_v0 = vmax.f32 %v161_v62, 0.0 }
  0xa4   :  { %374 = vmatmul.bf16.vlgmr.msra.gmra.mxu2 %v166_v1  ;;  %400 = vmatmul.bf16.vlgmr.msrb.gmra.mxu0 %v166_v1 }
  0xa5   :  { %v167_v2 = vpack.c.bf16 %v165_v0, %v165_v0  ;;  %v149_v3 = vpop.f32.mrf.mxu0 }
  0xa7   :  { %387 = vmatmul.bf16.vlgmr.msra.gmra.mxu3 %v167_v2  ;;  %413 = vmatmul.bf16.vlgmr.msrb.gmra.mxu1 %v167_v2 }
  0xa8   :  { %v162_v4 = vpop.f32.mrf.mxu1 }
 0x121   :  { %v401_v13 = vpop.f32.mrf.mxu0 }
 0x122   :  { %v402_v14 = vadd.f32 %v401_v13, %v203_v12 }
 0x124   :  { %v414_v15 = vpop.f32.mrf.mxu1 }
 0x125   :  { %v415_v16 = vadd.f32 %v414_v15, %v402_v14 }
 0x127   :  { %v419_v18 = vmax.f32 %v415_v16, 0.0  ;;  %v375_v19 = vpop.f32.mrf.mxu2 }
 0x128   :  { %v376_v21 = vadd.f32 %v375_v19, %v202_v17 }
 0x129   :  { %v421_v20 = vpack.c.bf16 %v419_v18, %v419_v18  ;;  %v403_v23 = vpop.f32.mrf.mxu0 }
 0x12a   :  { %v388_v22 = vpop.f32.mrf.mxu3 }
 0x12b   :  { %v389_v24 = vadd.f32 %v388_v22, %v376_v21  ;;  %571 = vmatmul.bf16.vlgmr.msrb.gmra.mxu3 %v421_v20 }
 0x12c   :  { %v416_v25 = vpop.f32.mrf.mxu1 }
 0x12d   :  { %v418_v26 = vmax.f32 %v389_v24, 0.0 }
 0x12f   :  { %v420_v27 = vpack.c.bf16 %v418_v26, %v418_v26  ;;  %v377_v28 = vpop.f32.mrf.mxu2 }
 0x131   :  { %558 = vmatmul.bf16.vlgmr.msrb.gmra.mxu2 %v420_v27 }
 0x132   :  { %v390_v29 = vpop.f32.mrf.mxu3 }
 0x1ae   :  { %v572_v30 = vpop.f32.mrf.mxu3 }
 0x1b4   :  { %v559_v32 = vpop.f32.mrf.mxu2 }
 0x1b5   :  { %v573_v33 = vadd.f32 %v572_v30, %v559_v32 }
 0x1b6   :  { %v574_v34 = vpop.f32.mrf.mxu3 }
 0x1b7   :  { %v580_v35 = vadd.f32 %v874_v31, %v573_v33 }
 0x1b9   :  { %582 = vst.msk [vmem:[#allocation11] sm:$0xff] %vm581_vm1, %v580_v35 }
 0x1ba   :  { %593 = dma.vmem_to_hbm [thread:$0]  %s589_s29, 128, %s591_s9, [#allocation4]  }
 0x1bc   :  { %v561_v36 = vpop.f32.mrf.mxu2 }
 0x1bd   :  { %1025 = dma.done.wait [#allocation4], 128  }
 0x1be   :  { %1026 = vsyncadd [#allocation4], 4294967168 }
 0x1bf   :  { %598 = vsyncpa [#allocation3], 1 }
 0x1c0   :  { %599 = vsyncpa [#allocation6], 1 }
 0x1c1   :  { %600 = vsyncpa [#allocation9], 1 }
 0x1c2   :  { %601 = vsyncpa [#allocation4], 1 }

</bundles_post_ra>
